<compile_context>
chip_gen: v7x
topology: tpu7x:2x2x1
jax: 0.10.0
libtpu: 0.0.40
codegen_flags: <defaults>
</compile_context>

<pallas_src>
import math

import jax
import jax.numpy as jnp
from jax.experimental import pallas as pl
from jax.experimental.pallas import tpu as pltpu


def _round_up(x, m):
    return ((x + m - 1) // m) * m


_TILE_M_CANDIDATES = (512, 256, 128, 64, 32, 16)
_TILE_K_CANDIDATES = (2048, 1024, 512, 256, 128)
_STEP_OVERHEAD_S = 0.35e-6     # fixed per-grid-step cost (measured ~v6e)
_HBM_BYTES_PER_S = 1.0e12      # order-of-magnitude HBM BW; only relative costs matter
_RHS_RESIDENT_MAX_BYTES = 4 * 1024 * 1024


def _choose_adj_tiles(n, adj_itemsize, compute_itemsize):
    """Pick (tm, tk) minimizing HBM traffic + per-step overhead.

    Accounts for (a) the extra pad+cast pass over adj when the tile grid does
    not divide n, (b) the kernel's own adj stream (original dtype on the
    no-copy fast path, compute dtype otherwise), (c) fixed per-grid-step
    overhead, and (d) a 2x megacore credit when there are >=2 row tiles (v7x).
    """
    n16 = _round_up(n, 16)
    n128 = _round_up(n, 128)
    best = None
    for tm in _TILE_M_CANDIDATES:
        if tm > n16 and tm != _TILE_M_CANDIDATES[-1]:
            continue
        for tk in _TILE_K_CANDIDATES:
            if tk > n128 and tk != _TILE_K_CANDIDATES[-1]:
                continue
            rows_p = _round_up(n, tm)
            cols_p = _round_up(n, tk)
            steps = (rows_p // tm) * (cols_p // tk)
            row_tiles = rows_p // tm
            aligned = (rows_p == n) and (cols_p == n)
            if aligned:
                pad_bytes = 0.0
                stream_bytes = n * n * adj_itemsize
            else:
                pad_bytes = n * n * adj_itemsize + rows_p * cols_p * compute_itemsize
                stream_bytes = rows_p * cols_p * compute_itemsize
            cores = min(2, row_tiles)
            cost = (pad_bytes / _HBM_BYTES_PER_S
                    + (stream_bytes / _HBM_BYTES_PER_S
                       + steps * _STEP_OVERHEAD_S) / cores)
            if best is None or cost < best[0]:
                best = (cost, tm, tk)
    return best[1], best[2]


def _make_gcn_kernel(apply_w, has_bias, rhs_resident, tk, compute_dtype):
    """Build the GCN kernel body.

    apply_w=True : f32 scratch acc += adj_k @ X_k ; epilogue out = acc @ W (+b)
    apply_w=False: resident f32 o_ref += adj_k @ support_k (init = bias at k==0)
    """

    def kernel(*refs):
        it = iter(refs)
        adj_ref = next(it)
        rhs_ref = next(it)
        w_ref = next(it) if apply_w else None
        b_ref = next(it) if has_bias else None
        o_ref = next(it)
        acc_ref = next(it) if apply_w else o_ref

        k = pl.program_id(1)

        @pl.when(k == 0)
        def _():
            if (not apply_w) and has_bias:
                # Fold the bias into the accumulator init -> epilogue is free.
                acc_ref[...] = jnp.broadcast_to(b_ref[...], acc_ref.shape)
            else:
                acc_ref[...] = jnp.zeros_like(acc_ref)

        # In-register cast to the MXU feed dtype (no-op if already that dtype).
        adj_tile = adj_ref[...].astype(compute_dtype)
        if rhs_resident:
            start = pl.multiple_of(k * tk, tk)
            rhs_tile = rhs_ref[pl.ds(start, tk), :]
        else:
            rhs_tile = rhs_ref[...]
        acc_ref[...] += jnp.dot(adj_tile, rhs_tile,
                                preferred_element_type=jnp.float32)

        if apply_w:
            @pl.when(k == pl.num_programs(1) - 1)
            def _():
                out = jnp.dot(acc_ref[...].astype(compute_dtype), w_ref[...],
                              preferred_element_type=jnp.float32)
                if has_bias:
                    out = out + b_ref[...]
                o_ref[...] = out.astype(o_ref.dtype)

    return kernel


def graph_convolution(x, adj, weight, bias=None, *,
                      compute_dtype=jnp.bfloat16, tm=None, tk=None):
    """Pallas GCN layer: adj @ (x @ weight) (+ bias). Returns float32 [N, out_f]."""
    n, in_f = x.shape
    in_f_w, out_f = weight.shape
    assert in_f == in_f_w
    assert adj.shape == (n, n)

    cdt = jnp.dtype(compute_dtype)
    csz = cdt.itemsize
    adj_sz = jnp.dtype(adj.dtype).itemsize

    # Lane-dense feature dims (multiples of 128 -> unmasked vst / full MXU feed).
    in_f_p = _round_up(in_f, 128)
    out_f_p = _round_up(out_f, 128)

    tm_auto, tk_auto = _choose_adj_tiles(n, adj_sz, csz)
    tm = tm_auto if tm is None else tm
    tk = tk_auto if tk is None else tk
    assert tm % 16 == 0 and tk % 128 == 0, "tm must be a multiple of 16, tk of 128"

    n_rows_p = _round_up(n, tm)
    n_cols_p = _round_up(n, tk)
    grid = (n_rows_p // tm, n_cols_p // tk)

    # --- adjacency: no-copy fast path when already tile-aligned --------------
    adj_aligned = (n_rows_p == n) and (n_cols_p == n)
    if adj_aligned:
        adj_in = adj                    # streamed as-is; cast to bf16 in-kernel
    else:
        # Pad + cast in a single fused pass (zero padding keeps the math exact).
        adj_in = jnp.zeros((n_rows_p, n_cols_p), cdt).at[:n, :n].set(
            adj.astype(cdt))
    adj_stream_sz = jnp.dtype(adj_in.dtype).itemsize

    # --- second matmul operand: X (apply W in epilogue) or hoisted support ---
    apply_w = in_f <= out_f             # stream the narrower operand
    has_bias = bias is not None

    if apply_w:
        rhs_w_p = in_f_p
        rhs = jnp.zeros((n_cols_p, in_f_p), cdt).at[:n, :in_f].set(x.astype(cdt))
        w_p = jnp.zeros((in_f_p, out_f_p), cdt).at[:in_f, :out_f].set(
            weight.astype(cdt))
    else:
        rhs_w_p = out_f_p
        # Hoisted out of the kernel: computed once in f32, cast fused into pad.
        support = jnp.dot(x.astype(jnp.float32), weight.astype(jnp.float32),
                          preferred_element_type=jnp.float32)
        rhs = jnp.zeros((n_cols_p, out_f_p), cdt).at[:n, :out_f].set(
            support.astype(cdt))
        w_p = None

    # Keep the full X / support resident in VMEM when small (one DMA total
    # instead of one per row tile); otherwise stream (tk, rhs_w) blocks.
    rhs_bytes = n_cols_p * rhs_w_p * csz
    rhs_resident = rhs_bytes <= _RHS_RESIDENT_MAX_BYTES
    if rhs_resident:
        rhs_spec = pl.BlockSpec((n_cols_p, rhs_w_p), lambda i, k: (0, 0))
    else:
        rhs_spec = pl.BlockSpec((tk, rhs_w_p), lambda i, k: (k, 0))

    in_specs = [pl.BlockSpec((tm, tk), lambda i, k: (i, k)), rhs_spec]
    args = [adj_in, rhs]
    if apply_w:
        in_specs.append(pl.BlockSpec((in_f_p, out_f_p), lambda i, k: (0, 0)))
        args.append(w_p)
    if has_bias:
        b_p = jnp.zeros((1, out_f_p), jnp.float32).at[0, :out_f].set(
            bias.astype(jnp.float32))
        in_specs.append(pl.BlockSpec((1, out_f_p), lambda i, k: (0, 0)))
        args.append(b_p)

    scratch_shapes = []
    if apply_w:
        scratch_shapes.append(pltpu.VMEM((tm, in_f_p), jnp.float32))

    # VMEM budget from the actual footprint (W / bias / resident rhs are
    # effectively single-buffered), plus headroom; capped under v7x's 64 MiB/TC.
    footprint = (2 * tm * tk * adj_stream_sz                       # adj dbl buf
                 + (rhs_bytes if rhs_resident else 2 * tk * rhs_w_p * csz)
                 + 2 * tm * out_f_p * 4)                           # f32 out dbl buf
    if apply_w:
        footprint += in_f_p * out_f_p * csz                        # W (resident)
        footprint += tm * in_f_p * 4                               # f32 accumulator
    if has_bias:
        footprint += out_f_p * 4
    vmem_limit = int(min(max(footprint + (4 << 20), 16 << 20), 56 << 20))

    kernel = _make_gcn_kernel(apply_w, has_bias, rhs_resident, tk, cdt)

    out_p = pl.pallas_call(
        kernel,
        out_shape=jax.ShapeDtypeStruct((n_rows_p, out_f_p), jnp.float32),
        grid_spec=pltpu.PrefetchScalarGridSpec(
            num_scalar_prefetch=0,
            grid=grid,
            in_specs=in_specs,
            out_specs=pl.BlockSpec((tm, out_f_p), lambda i, k: (i, 0)),
            scratch_shapes=scratch_shapes,
        ),
        compiler_params=pltpu.CompilerParams(
            dimension_semantics=("parallel", "arbitrary"),
            vmem_limit_bytes=vmem_limit,
        ),
    )(*args)

    return out_p[:n, :out_f]


def _make_inputs(key, n, in_f, out_f):
    k_x, k_adj, k_w, k_b = jax.random.split(key, 4)
    x = jax.random.normal(k_x, (n, in_f), dtype=jnp.float32)
    # Row-normalized random adjacency (dense stand-in for the sparse adj).
    adj_raw = (jax.random.uniform(k_adj, (n, n)) > 0.8).astype(jnp.float32)
    adj_raw = adj_raw + jnp.eye(n, dtype=jnp.float32)     # self loops
    adj = adj_raw / jnp.sum(adj_raw, axis=1, keepdims=True)
    # reset_parameters(): U(-stdv, stdv), stdv = 1/sqrt(out_features).
    stdv = 1.0 / math.sqrt(out_f)
    weight = jax.random.uniform(k_w, (in_f, out_f), minval=-stdv, maxval=stdv,
                                dtype=jnp.float32)
    bias = jax.random.uniform(k_b, (out_f,), minval=-stdv, maxval=stdv,
                              dtype=jnp.float32)
    return x, adj, weight, bias


if __name__ == "__main__":
    key = jax.random.PRNGKey(0)
    k1, k2, k3 = jax.random.split(key, 3)
    BF16_TOL = dict(atol=3e-2, rtol=3e-2)   # bf16 MXU feed
    F32_TOL = dict(atol=2e-3, rtol=2e-3)    # f32 compute path

    # Case A1: small demo (in_f <= out_f -> W in epilogue), padded-adj path,
    # bf16 MXU feed, with bias.
    N, IN_F, OUT_F = 64, 16, 32
    x, adj, w, b = _make_inputs(k1, N, IN_F, OUT_F)
    ref = adj @ (x @ w) + b
    out = jax.block_until_ready(graph_convolution(x, adj, w, b))
    assert out.shape == (N, OUT_F)
    assert jnp.allclose(out, ref, **BF16_TOL), "mismatch (A1 bf16)"

    # Case A2: same shape, no bias (bias-free kernel variant).
    out_nb = jax.block_until_ready(graph_convolution(x, adj, w, None))
    assert jnp.allclose(out_nb, adj @ (x @ w), **BF16_TOL), "mismatch (A2 no bias)"

    # Case A3/A4: aligned no-copy adjacency fast path, multi-k accumulation,
    # resident-rhs dynamic slicing (forced 128x128 tiles); bf16 and f32 paths.
    N3, IN_F3, OUT_F3 = 256, 16, 32
    x3, adj3, w3, b3 = _make_inputs(k3, N3, IN_F3, OUT_F3)
    ref3 = adj3 @ (x3 @ w3) + b3
    out3 = jax.block_until_ready(graph_convolution(x3, adj3, w3, b3, tm=128, tk=128))
    assert jnp.allclose(out3, ref3, **BF16_TOL), "mismatch (A3 bf16 multi-k)"
    out3_f32 = jax.block_until_ready(
        graph_convolution(x3, adj3, w3, b3, compute_dtype=jnp.float32, tm=128, tk=128))
    assert jnp.allclose(out3_f32, ref3, **F32_TOL), "mismatch (A4 f32 multi-k)"

    # Case B1: out_f < in_f -> support hoisted out of the kernel and streamed,
    # output block used directly as the accumulator; auto tiles, aligned path.
    N2, IN_F2, OUT_F2 = 512, 48, 24
    x2, adj2, w2, b2 = _make_inputs(k2, N2, IN_F2, OUT_F2)
    ref2 = adj2 @ (x2 @ w2) + b2
    out2 = jax.block_until_ready(graph_convolution(x2, adj2, w2, b2))
    assert out2.shape == (N2, OUT_F2)
    assert jnp.allclose(out2, ref2, **BF16_TOL), "mismatch (B1 bf16)"

    # Case B2/B3: same shapes with forced tiles -> multi-k accumulation into
    # the resident output block; bf16 and exact f32 paths.
    out2b = jax.block_until_ready(
        graph_convolution(x2, adj2, w2, b2, tm=256, tk=128))
    assert jnp.allclose(out2b, ref2, **BF16_TOL), "mismatch (B2 bf16 multi-k)"
    out2c = jax.block_until_ready(
        graph_convolution(x2, adj2, w2, b2, compute_dtype=jnp.float32, tm=256, tk=128))
    assert jnp.allclose(out2c, ref2, **F32_TOL), "mismatch (B3 f32 multi-k)"

    print("KERNEL_OK")
</pallas_src>

<mosaic_0001>
module attributes {stable_mosaic.version = 11 : i64} {
  func.func @kernel(%arg0: i32, %arg1: i32, %arg2: memref<32x128xbf16, #tpu.memory_space<vmem>>, %arg3: memref<128x128xbf16, #tpu.memory_space<vmem>>, %arg4: memref<128x128xbf16, #tpu.memory_space<vmem>>, %arg5: memref<1x128xf32, #tpu.memory_space<vmem>>, %arg6: memref<32x128xf32, #tpu.memory_space<vmem>>, %arg7: memref<32x128xf32, #tpu.memory_space<vmem>>) attributes {dimension_semantics = [#tpu.dimension_semantics<parallel>, #tpu.dimension_semantics<arbitrary>], iteration_bounds = array<i64: 2, 1>, scalar_prefetch = 0 : i64, scratch_operands = 1 : i64, tpu.core_type = #tpu.core_type<tc>, window_params = [{transform_indices = @transform_0, window_bounds = array<i64: 32, 128>}, {pipeline_mode = #tpu.pipeline_mode<synchronous>, transform_indices = @transform_1, window_bounds = array<i64: 128, 128>}, {pipeline_mode = #tpu.pipeline_mode<synchronous>, transform_indices = @transform_2, window_bounds = array<i64: 128, 128>}, {pipeline_mode = #tpu.pipeline_mode<synchronous>, transform_indices = @transform_3, window_bounds = array<i64: 1, 128>}, {transform_indices = @transform_4, window_bounds = array<i64: 32, 128>}]} {
    %c0_i32 = arith.constant 0 : i32
    %0 = arith.cmpi eq, %arg1, %c0_i32 : i32
    %1 = arith.extui %0 : i1 to i32
    %c0_i32_0 = arith.constant 0 : i32
    %2 = arith.cmpi ne, %1, %c0_i32_0 : i32
    scf.if %2 {
      %cst_9 = arith.constant 0.000000e+00 : f32
      %15 = vector.broadcast %cst_9 : f32 to vector<32x128xf32>
      %c0_10 = arith.constant 0 : index
      %c0_11 = arith.constant 0 : index
      %16 = vector.load %arg7[%c0_10, %c0_11] : memref<32x128xf32, #tpu.memory_space<vmem>>, vector<32x128xf32>
      tpu.vector_store %arg7[%c0_10, %c0_11], %15 {strides = array<i32>} : memref<32x128xf32, #tpu.memory_space<vmem>>, vector<32x128xf32>,
    } else {
    }
    %c0 = arith.constant 0 : index
    %c0_1 = arith.constant 0 : index
    %3 = vector.load %arg2[%c0, %c0_1] : memref<32x128xbf16, #tpu.memory_space<vmem>>, vector<32x128xbf16>
    %c128_i32 = arith.constant 128 : i32
    %4 = arith.muli %arg1, %c128_i32 : i32
    %5 = tpu.assume_multiple %4, 128 : i32
    %6 = arith.index_cast %5 : i32 to index
    %c0_2 = arith.constant 0 : index
    %7 = vector.load %arg3[%6, %c0_2] : memref<128x128xbf16, #tpu.memory_space<vmem>>, vector<128x128xbf16>
    %c0_3 = arith.constant 0 : index
    %c0_4 = arith.constant 0 : index
    %8 = vector.load %arg7[%c0_3, %c0_4] : memref<32x128xf32, #tpu.memory_space<vmem>>, vector<32x128xf32>
    %cst = arith.constant dense<0.000000e+00> : vector<32x128xf32>
    %9 = tpu.matmul %3, %7, %cst {dimension_numbers = #tpu.dot_dimension_numbers<[1], [0], [0], [1], [0, 0, 1, 1], [], []>} : vector<32x128xbf16>, vector<128x128xbf16>, vector<32x128xf32> -> vector<32x128xf32>
    %10 = arith.addf %8, %9 : vector<32x128xf32>
    %c0_5 = arith.constant 0 : index
    %c0_6 = arith.constant 0 : index
    %11 = vector.load %arg7[%c0_5, %c0_6] : memref<32x128xf32, #tpu.memory_space<vmem>>, vector<32x128xf32>
    tpu.vector_store %arg7[%c0_5, %c0_6], %10 {strides = array<i32>} : memref<32x128xf32, #tpu.memory_space<vmem>>, vector<32x128xf32>,
    %c0_i32_7 = arith.constant 0 : i32
    %12 = arith.cmpi eq, %arg1, %c0_i32_7 : i32
    %13 = arith.extui %12 : i1 to i32
    %c0_i32_8 = arith.constant 0 : i32
    %14 = arith.cmpi ne, %13, %c0_i32_8 : i32
    scf.if %14 {
      %c0_9 = arith.constant 0 : index
      %c0_10 = arith.constant 0 : index
      %15 = vector.load %arg7[%c0_9, %c0_10] : memref<32x128xf32, #tpu.memory_space<vmem>>, vector<32x128xf32>
      %16 = arith.truncf %15 : vector<32x128xf32> to vector<32x128xbf16>
      %c0_11 = arith.constant 0 : index
      %c0_12 = arith.constant 0 : index
      %17 = vector.load %arg4[%c0_11, %c0_12] : memref<128x128xbf16, #tpu.memory_space<vmem>>, vector<128x128xbf16>
      %cst_13 = arith.constant dense<0.000000e+00> : vector<32x128xf32>
      %18 = tpu.matmul %16, %17, %cst_13 {dimension_numbers = #tpu.dot_dimension_numbers<[1], [0], [0], [1], [0, 0, 1, 1], [], []>} : vector<32x128xbf16>, vector<128x128xbf16>, vector<32x128xf32> -> vector<32x128xf32>
      %c0_14 = arith.constant 0 : index
      %c0_15 = arith.constant 0 : index
      %19 = vector.load %arg5[%c0_14, %c0_15] : memref<1x128xf32, #tpu.memory_space<vmem>>, vector<1x128xf32>
      %20 = vector.broadcast %19 : vector<1x128xf32> to vector<32x128xf32>
      %21 = arith.addf %18, %20 : vector<32x128xf32>
      %c0_16 = arith.constant 0 : index
      %c0_17 = arith.constant 0 : index
      %22 = vector.load %arg6[%c0_16, %c0_17] : memref<32x128xf32, #tpu.memory_space<vmem>>, vector<32x128xf32>
      tpu.vector_store %arg6[%c0_16, %c0_17], %21 {strides = array<i32>} : memref<32x128xf32, #tpu.memory_space<vmem>>, vector<32x128xf32>,
    } else {
    }
    return
  }
  func.func @transform_0(%arg0: i32, %arg1: i32) -> (i32, i32) {
    %c0_i32 = arith.constant 0 : i32
    return %arg0, %arg1 : i32, i32
  }
  func.func @transform_1(%arg0: i32, %arg1: i32) -> (i32, i32) {
    %c0_i32 = arith.constant 0 : i32
    %c0_i32_0 = arith.constant 0 : i32
    %c0_i32_1 = arith.constant 0 : i32
    return %c0_i32, %c0_i32_0 : i32, i32
  }
  func.func @transform_2(%arg0: i32, %arg1: i32) -> (i32, i32) {
    %c0_i32 = arith.constant 0 : i32
    %c0_i32_0 = arith.constant 0 : i32
    %c0_i32_1 = arith.constant 0 : i32
    return %c0_i32, %c0_i32_0 : i32, i32
  }
  func.func @transform_3(%arg0: i32, %arg1: i32) -> (i32, i32) {
    %c0_i32 = arith.constant 0 : i32
    %c0_i32_0 = arith.constant 0 : i32
    %c0_i32_1 = arith.constant 0 : i32
    return %c0_i32, %c0_i32_0 : i32, i32
  }
  func.func @transform_4(%arg0: i32, %arg1: i32) -> (i32, i32) {
    %c0_i32 = arith.constant 0 : i32
    %c0_i32_0 = arith.constant 0 : i32
    return %arg0, %c0_i32 : i32, i32
  }
}

</mosaic_0001>

<bundles_post_ra>
// kernel: tpu_custom_call.1
= control target key start
LH: loop header
LB: loop body
LE: loop exit
PB: predicated region body
PF: predicated region fallthrough
CT: control target
= control target key end

     0   :  { %9 = vsyncpa [#allocation4], 0  ;;  %s1352_s0 = inlined_call_operand.hbm [shape: bf16[64,128], index: 0, kind: input, shape index: {}]   ;;  %s1353_s1 = inlined_call_operand.hbm [shape: bf16[128,128], index: 1, kind: input, shape index: {}]   ;;  %s1354_s2 = inlined_call_operand.hbm [shape: bf16[128,128], index: 2, kind: input, shape index: {}]   ;;  %s1355_s3 = inlined_call_operand.vmem [shape: f32[1,128], index: 3, kind: input, shape index: {}]   ;;  %s1356_s4 = inlined_call_operand.hbm [shape: f32[64,128], index: 4, kind: output, shape index: {}]  }
   0x1   :  { %11 = vsyncpa [#allocation4 + $0x1], 0 }
   0x2   :  { %12 = vsyncpa [#allocation7], 0 }
   0x3   :  { %13 = vsyncpa [#allocation5], 0 }
   0x4   :  { %15 = vsyncpa [#allocation5 + $0x1], 0  ;;  %s1080_s15 = smov 0   ;;  %s1082_s16 = smov 0  }
   0x5   :  { %s1084_s17 = smov 0   ;;  %s1086_s18 = smov 0  }
   0x6   :  { %s1088_s19 = smov 0   ;;  %s1090_s20 = smov 0  }
   0x7 LB: > { %s668_s21 = sadd.s32 4294967295, %s1045_s20   ;;  %s669_s22 = sadd.s32 4294967294, %s1045_s20   ;;  %s1045_s20 = sphi %s1090_s20, %s21_s20   ;;  %s1041_s19 = sphi %s1088_s19, %s1378_s19   ;;  %s1037_s18 = sphi %s1086_s18, %s1377_s18   ;;  %s1033_s17 = sphi %s1084_s17, %s1376_s17   ;;  %s1029_s16 = sphi %s1082_s16, %s1375_s16   ;;  %s1025_s15 = sphi %s1080_s15, %s1374_s15  }
   0x8   : > { %p55_p0 = scmp.ne.s32.totalorder %s1029_s16, %s1025_s15  ;;  %p1114_p1 = scmp.eq.s32.totalorder %s668_s21, 0 }
   0x9   : > { %p1118_p2 = scmp.eq.s32.totalorder %s668_s21, 1  ;;  %p148_p3 = scmp.eq.s32.totalorder %s669_s22, 1 }
   0xa   : > { %s1361_s23 = scalar_select %p1114_p1, 1, 0 }
   0xb   : > { %p1124_p4 = por %p1114_p1, %p55_p0  ;;  %p670_p5 = scmp.ge.s32.totalorder %s1045_s20, 1 }
   0xc   : > { %p1129_p6 = por %p148_p3, %p55_p0  ;;  %p155_p7 = scmp.lt.s32.totalorder %s1045_s20, 3 }
   0xd   : > { %s1363_s25 = scalar_select %p1124_p4, 1, 0 }
   0xe   : > { %s1364_s26 = scalar_select %p1129_p6, 1, 0 }
   0xf   : > { %p1134_p8 = pnand %p670_p5, %p155_p7  ;;  %s1047_s28 = smov [#allocation6]  }
  0x10   : > { %s167_s29 = sshll.u32 %s1047_s28, 4  ;;  %s1048_s5 = smov [#allocation8]   ;;  %s1138_s29 = int_to_ptr.vmem [resolvable:$true] %s167_s29 }
  0x11   : > { %p780_p9 = pneg %p1134_p8  ;;  %s180_s6 = sshll.u32 %s1048_s5, 4  ;;  %s1149_s6 = int_to_ptr.vmem [resolvable:$true] %s180_s6 }
  0x12   : > { %s873_s9 = scalar_lea.hbm %s1353_s1, 1024 }
  0x13   : > { %p1145_p11 = pnand %p780_p9, %p1114_p1  ;;  %p874_p12 = scmp.ne.s32.totalorder %s1353_s1, %s873_s9 }
  0x14   : > { %p880_p5 = scmp.lt.u32.totalorder %s873_s9, %s1353_s1 }
  0x15   : > { %p875_p13 = pneg %p1145_p11 }
  0x17   : > { %p876_p0 = pnand %p875_p13, %p874_p12 }
  0x19   : > { %p877_p3 = pneg %p876_p0 }
  0x1b   : > { %p882_p7 = pnand %p880_p5, %p877_p3 }
  0x1d   : > { %885 = shalt.err (!%p882_p7)
}
  0x1e   : > { %s886_s14 = scalar_lea.vmem %s1138_s29, 1024  ;;  %p894_p1 = scmp.lt.s32.totalorder %s1138_s29, %s1138_s29 }
  0x1f   : > { %p887_p9 = scmp.ne.s32.totalorder %s1138_s29, %s886_s14  ;;  %p895_p12 = scmp.lt.s32.totalorder %s886_s14, %s886_s14 }
  0x21   : > { %p889_p10 = pnand %p887_p9, %p875_p13  ;;  %p896_p0 = por %p895_p12, %p894_p1 }
  0x23   : > { %p890_p6 = pneg %p889_p10 }
  0x25   : > { %p897_p4 = pnand %p896_p0, %p890_p6 }
  0x27   : > { %900 = shalt.err (!%p897_p4)
}
  0x28   : > { %s1049_s21 = smov 64   ;;  %s1050_s22 = smov 4  }
  0x29   : > { %783 = dma.hbm_to_vmem [thread:$0]  (!%p1145_p11), %s1353_s1, 1024, %s1138_s29, [#allocation7], %s1049_s21, %s1049_s21, %s1050_s22  }
  0x2a   : > { %s901_s9 = scalar_lea.hbm %s1354_s2, 1024 }
  0x2b   : > { %p902_p1 = scmp.ne.s32.totalorder %s1354_s2, %s901_s9  ;;  %p908_p10 = scmp.lt.u32.totalorder %s901_s9, %s1354_s2 }
  0x2d   : > { %p904_p4 = pnand %p902_p1, %p875_p13 }
  0x2f   : > { %p905_p6 = pneg %p904_p4 }
  0x31   : > { %p910_p3 = pnand %p908_p10, %p905_p6 }
  0x33   : > { %913 = shalt.err (!%p910_p3)
}
  0x34   : > { %s914_s29 = scalar_lea.vmem %s1149_s6, 1024  ;;  %p922_p12 = scmp.lt.s32.totalorder %s1149_s6, %s1149_s6 }
  0x35   : > { %p915_p5 = scmp.ne.s32.totalorder %s1149_s6, %s914_s29  ;;  %p923_p0 = scmp.lt.s32.totalorder %s914_s29, %s914_s29 }
  0x37   : > { %p917_p7 = pnand %p915_p5, %p875_p13  ;;  %p924_p1 = por %p923_p0, %p922_p12 }
  0x39   : > { %p918_p9 = pneg %p917_p7 }
  0x3b   : > { %p925_p4 = pnand %p924_p1, %p918_p9 }
  0x3d   : > { %928 = shalt.err (!%p925_p4)
}
  0x3e   : > { %786 = dma.hbm_to_vmem [thread:$0]  (!%p1145_p11), %s1354_s2, 1024, %s1149_s6, [#allocation7], %s1049_s21, %s1049_s21, %s1050_s22  }
  0x3f   : > { %s33_s30 = sadd.s32 1, %s1041_s19  ;;  %s42_s5 = sadd.s32 1, %s1033_s17 }
  0x40   : > { %p35_p13 = scmp.ge.s32.totalorder %s33_s30, 2  ;;  %p49_p6 = scmp.ne.s32.totalorder %s1033_s17, %s1029_s16 }
  0x41   : > { %p50_p10 = scmp.eq.s32.totalorder %s1045_s20, 0  ;;  %p797_p3 = scmp.lt.s32.totalorder %s1045_s20, 2 }
  0x42   : > { %s1380_s30 = smov (%p35_p13, %s33_s30), 0  ;;  %p1219_p7 = por %p1118_p2, %p49_p6 }
  0x43   : > { %p51_p5 = por %p50_p10, %p49_p6  ;;  %s37_s8 = ssub.s32 %s1041_s19, %s1380_s30 }
  0x44   : > { %s1367_s7 = scalar_select %p1219_p7, 1, 0 }
  0x45   : > { %s197_s9 = sand.u32 1, %s1033_s17   ;;  %p40_p9 = scmp.eq.s32.totalorder %s37_s8, 0 }
  0x46   : > { %s674_s6 = sshll.u32 %s197_s9, 4  ;;  %s706_s10 = sshll.u32 %s1041_s19, 8 }
  0x47   : > { %s1228_s11 = scalar_select %p40_p9, %s1033_s17, %s42_s5  }
  0x48   : > { %s1233_s29 = scalar_lea.hbm %s1352_s0, %s706_s10  ;;  %s201_s24 = scalar_lea.vmem [#allocation3], %s674_s6 }
  0x49   : > { %s209_s14 = sshll.u32 %s201_s24, 4  ;;  %p1237_p2 = pnand %p797_p3, %p51_p5  ;;  %s1241_s14 = int_to_ptr.vmem [resolvable:$true] %s209_s14 }
  0x4a   : > { %s1243_s5 = scalar_lea.sflag [#allocation4], %s197_s9  ;;  %s929_s8 = scalar_lea.hbm %s1233_s29, 256 }
  0x4b   : > { %p930_p11 = scmp.ne.s32.totalorder %s1233_s29, %s929_s8  ;;  %p931_p12 = pneg %p1237_p2 }
  0x4c   : > { %s934_s12 = scalar_lea.hbm %s1352_s0, 512  ;;  %p935_p4 = scmp.lt.u32.totalorder %s1233_s29, %s1352_s0 }
  0x4d   : > { %p932_p0 = pnand %p931_p12, %p930_p11  ;;  %p936_p13 = scmp.lt.u32.totalorder %s934_s12, %s929_s8 }
  0x4e   : > { %p938_p10 = scmp.lt.u32.totalorder %s929_s8, %s1233_s29 }
  0x4f   : > { %p933_p1 = pneg %p932_p0  ;;  %p937_p6 = por %p936_p13, %p935_p4 }
  0x51   : > { %p939_p3 = por %p938_p10, %p937_p6 }
  0x53   : > { %p940_p5 = pnand %p939_p3, %p933_p1 }
  0x55   : > { %943 = shalt.err (!%p940_p5)
}
  0x56   : > { %s944_s9 = scalar_lea.vmem %s1241_s14, 256  ;;  %s1051_s6 = smov [#allocation3]  }
  0x57   : > { %p945_p9 = scmp.ne.s32.totalorder %s1241_s14, %s944_s9  ;;  %s949_s10 = sshll.u32 %s1051_s6, 4  ;;  %s950_s10 = int_to_ptr.vmem [resolvable:$false] %s949_s10 }
  0x58   : > { %s951_s13 = scalar_lea.vmem %s950_s10, 512  ;;  %p952_p7 = scmp.lt.s32.totalorder %s1241_s14, %s950_s10 }
  0x59   : > { %p947_p11 = pnand %p945_p9, %p931_p12  ;;  %p953_p4 = scmp.lt.s32.totalorder %s951_s13, %s944_s9 }
  0x5b   : > { %p948_p0 = pneg %p947_p11  ;;  %p954_p13 = por %p953_p4, %p952_p7 }
  0x5d   : > { %p955_p6 = pnand %p954_p13, %p948_p0 }
  0x5f   : > { %958 = shalt.err (!%p955_p6)
}
  0x60   : > { %790 = dma.hbm_to_vmem [thread:$0]  (!%p1237_p2), %s1233_s29, 256, %s1241_s14, %s1243_s5, %s1049_s21, %s1049_s21, %s1050_s22  }
  0x61   : > { %221 = sbr.rel (%p1134_p8) target bundleno = 591 (0x24f), region = 36  ;;  %s1277_s8 = sand.u32 (!%p1134_p8), 1, %s1029_s16  }
  0x62   : > { %s678_s12 = sshll.u32 (!%p1134_p8), %s1277_s8, 4  ;;  %s224_s24 = scalar_lea.sflag (!%p1134_p8), [#allocation4], %s1277_s8 }
  0x63   : > { %s1281_s9 = scalar_lea.vmem (!%p1134_p8), [#allocation3], %s678_s12  ;;  %p1369_p7 = scmp.ne.s32.totalorder (!%p1134_p8), %s1363_s25, 0 }
  0x68   : > { %1012 = dma.done.wait (%p1369_p7), %s224_s24, 256  }
  0x69   : > { %1014 = vsyncadd (%p1369_p7), %s224_s24, 4294967040  ;;  %p1370_p2 = scmp.ne.s32.totalorder %s1361_s23, 0 }
  0x6b   : > { %1016 = dma.done.wait (%p1370_p2), [#allocation7], 2048  }
  0x6c   : > { %1018 = vsyncadd (%p1370_p2), [#allocation7], 4294965248  ;;  %v855_v0 = vld [vmem:[#allocation6] sm:$0xff]   ;;  %v856_v1 = vld [vmem:[#allocation6 + $0x8] sm:$0xff]   ;;  %s681_s23 = sshll.u32 %s1277_s8, 5  ;;  %s707_s29 = sshll.u32 %s1037_s18, 9 }
  0x6d   : > { %728 = vmatprep.subr.bf16.mxu0 %v855_v0  ;;  %v857_v2 = vld [vmem:[#allocation6 + $0x10] sm:$0xff]   ;;  %v858_v3 = vld [vmem:[#allocation6 + $0x18] sm:$0xff]   ;;  %v865_v5 = vld [vmem:[#allocation8] sm:$0xff]   ;;  %s259_s21 = scalar_lea.vmem [#allocation9], %s681_s23  ;;  %s1303_s5 = scalar_lea.hbm %s1356_s4, %s707_s29 }
  0x6e   : > { %729 = vmatpush3.bf16.msra.mxu0 %v855_v0  ;;  %v863_v4 = vld [vmem:[%s1281_s9] sm:$0xff]   ;;  %v866_v6 = vld [vmem:[#allocation8 + $0x8] sm:$0xff]   ;;  %748 = vmatprep.subr.bf16.mxu1 %v865_v5  ;;  %v868_v10 = vld [vmem:[#allocation8 + $0x18] sm:$0xff]   ;;  %s564_s22 = sshll.u32 %s259_s21, 4  ;;  %s551_s18 = scalar_lea.sflag [#allocation5], %s1277_s8  ;;  %s1298_s22 = int_to_ptr.vmem [resolvable:$true] %s564_s22 }
  0x6f   : > { %730 = vmatprep.subr.bf16.mxu0 %v856_v1  ;;  %744 = vmatprep.mubr.bf16.mxu0 %v863_v4  ;;  %v859_v7 = vld [vmem:[#allocation6 + $0x20] sm:$0xff]   ;;  %v867_v8 = vld [vmem:[#allocation8 + $0x10] sm:$0xff]   ;;  %v860_v9 = vld [vmem:[#allocation6 + $0x28] sm:$0xff]   ;;  %s959_s6 = scalar_lea.vmem %s1298_s22, 512  ;;  %p1371_p12 = scmp.ne.s32.totalorder %s1367_s7, 0 }
  0x70   : > { %749 = vmatpush3.bf16.msra.mxu1 %v865_v5  ;;  %v861_v11 = vld [vmem:[#allocation6 + $0x30] sm:$0xff]   ;;  %v869_v12 = vld [vmem:[#allocation8 + $0x20] sm:$0xff]   ;;  %v862_v13 = vld [vmem:[#allocation6 + $0x38] sm:$0xff]   ;;  %p960_p8 = scmp.ne.s32.totalorder %s1298_s22, %s959_s6  ;;  %s1052_s10 = smov [#allocation9]  }
  0x71   : > { %750 = vmatprep.subr.bf16.mxu1 %v866_v6  ;;  %v870_v14 = vld [vmem:[#allocation8 + $0x28] sm:$0xff]   ;;  %v871_v16 = vld [vmem:[#allocation8 + $0x30] sm:$0xff]   ;;  %v872_v17 = vld [vmem:[#allocation8 + $0x38] sm:$0xff]   ;;  %s963_s13 = sshll.u32 %s1052_s10, 4  ;;  %s964_s13 = int_to_ptr.vmem [resolvable:$false] %s963_s13 }
  0x72   : > { %731 = vmatpush3.bf16.msra.mxu0 %v856_v1  ;;  %v864_v15 = vld [vmem:[%s1281_s9 + $0x8] sm:$0xff]   ;;  %v692_v24 = vld [vmem:[%s1355_s3] ss:$0 sm:$0xff]  ;;  %p961_p1 = pnand %p960_p8, %p1371_p12  ;;  %s965_s12 = scalar_lea.vmem %s964_s13, 1024 }
  0x73   : > { %732 = vmatprep.subr.bf16.mxu0 %v857_v2  ;;  %p966_p3 = scmp.lt.s32.totalorder %s1298_s22, %s964_s13  ;;  %p967_p5 = scmp.lt.s32.totalorder %s965_s12, %s959_s6 }
  0x74   : > { %751 = vmatpush3.bf16.msra.mxu1 %v866_v6  ;;  %p962_p10 = pneg %p961_p1 }
  0x75   : > { %752 = vmatprep.subr.bf16.mxu1 %v867_v8  ;;  %p968_p9 = por %p967_p5, %p966_p3 }
  0x76   : > { %733 = vmatpush3.bf16.msra.mxu0 %v857_v2 }
  0x77   : > { %734 = vmatprep.subr.bf16.mxu0 %v858_v3  ;;  %p969_p11 = pnand %p968_p9, %p962_p10 }
  0x78   : > { %753 = vmatpush3.bf16.msra.mxu1 %v867_v8 }
  0x79   : > { %754 = vmatprep.subr.bf16.mxu1 %v868_v10 }
  0x7a   : > { %735 = vmatpush3.bf16.msra.mxu0 %v858_v3 }
  0x7b   : > { %736 = vmatprep.subr.bf16.mxu0 %v859_v7 }
  0x7c   : > { %755 = vmatpush3.bf16.msra.mxu1 %v868_v10 }
  0x7d   : > { %756 = vmatprep.subr.bf16.mxu1 %v869_v12 }
  0x7e   : > { %737 = vmatpush3.bf16.msra.mxu0 %v859_v7 }
  0x7f   : > { %738 = vmatprep.subr.bf16.mxu0 %v860_v9 }
  0x80   : > { %757 = vmatpush3.bf16.msra.mxu1 %v869_v12 }
  0x81   : > { %758 = vmatprep.subr.bf16.mxu1 %v870_v14 }
  0x82   : > { %739 = vmatpush3.bf16.msra.mxu0 %v860_v9 }
  0x83   : > { %740 = vmatprep.subr.bf16.mxu0 %v861_v11 }
  0x84   : > { %759 = vmatpush3.bf16.msra.mxu1 %v870_v14 }
  0x85   : > { %760 = vmatprep.subr.bf16.mxu1 %v871_v16 }
  0x86   : > { %741 = vmatpush3.bf16.msra.mxu0 %v861_v11 }
  0x87   : > { %742 = vmatprep.subr.bf16.mxu0 %v862_v13 }
  0x88   : > { %761 = vmatpush3.bf16.msra.mxu1 %v871_v16 }
  0x89   : > { %762 = vmatprep.subr.bf16.mxu1 %v872_v17 }
  0x8a   : > { %743 = vmatpush3.bf16.msra.mxu0 %v862_v13 }
  0x8c   : > { %763 = vmatpush3.bf16.msra.mxu1 %v872_v17 }
  0x8d   : > { %745 = vmatmul.mubr.bf16.vlgmr.msra.gmra.mrb[0].mxu0 %v864_v15 }
 0x160   : > { %v746_v18 = vpop.f32.mrb[0].mxu0 }
 0x161   : > { %v394_v19 = vpop.f32.mrb[1].mxu0 }
 0x162   : > { %v747_v20 = vpop.f32.mrb[2].mxu0 }
 0x163   : > { %v425_v21 = vpack.c.bf16 %v747_v20, %v746_v18  ;;  %v397_v22 = vpop.f32.mrb[3].mxu0 }
 0x164   : > { %v424_v23 = vpack.c.bf16 %v397_v22, %v394_v19 }
 0x166   : > { %764 = vmatprep.mubr.bf16.mxu1 %v424_v23 }
 0x167   : > { %765 = vmatmul.mubr.bf16.vlgmr.msra.gmra.mrb[0].mxu1 %v425_v21 }
 0x23a   : > { %v766_v25 = vpop.f32.mrb[0].mxu1 }
 0x23b   : > { %v540_v26 = vadd.f32 %v766_v25, %v692_v24  ;;  %v531_v27 = vpop.f32.mrb[1].mxu1 }
 0x23c   : > { %v532_v28 = vadd.f32 %v692_v24, %v531_v27  ;;  %v767_v29 = vpop.f32.mrb[2].mxu1 }
 0x23d   : > { %548 = vst [vmem:[%s259_s21 + $0x10] sm:$0xff] %v540_v26  ;;  %v543_v30 = vadd.f32 %v767_v29, %v692_v24  ;;  %v534_v31 = vpop.f32.mrb[3].mxu1 }
 0x23e   : > { %546 = vst [vmem:[%s259_s21] sm:$0xff] %v532_v28  ;;  %v535_v32 = vadd.f32 %v692_v24, %v534_v31 }
 0x23f   : > { %549 = vst [vmem:[%s259_s21 + $0x18] sm:$0xff] %v543_v30 }
 0x240   : > { %547 = vst [vmem:[%s259_s21 + $0x8] sm:$0xff] %v535_v32 }
 0x241   : > { %972 = shalt.err (!%p969_p11)
}
 0x242   : > { %s973_s24 = scalar_lea.hbm %s1303_s5, 512  ;;  %s977_s25 = scalar_lea.hbm %s1356_s4, 1024 }
 0x243   : > { %p974_p0 = scmp.ne.s32.totalorder %s1303_s5, %s973_s24  ;;  %p978_p6 = scmp.lt.u32.totalorder %s1303_s5, %s1356_s4 }
 0x244   : > { %p979_p7 = scmp.lt.u32.totalorder %s977_s25, %s973_s24  ;;  %p981_p8 = scmp.lt.u32.totalorder %s973_s24, %s1303_s5 }
 0x245   : > { %p975_p4 = pnand %p974_p0, %p1371_p12 }
 0x246   : > { %p980_p2 = por %p979_p7, %p978_p6 }
 0x247   : > { %p976_p13 = pneg %p975_p4 }
 0x248   : > { %p982_p1 = por %p981_p8, %p980_p2 }
 0x24a   : > { %p983_p10 = pnand %p982_p1, %p976_p13 }
 0x24c   : > { %986 = shalt.err (!%p983_p10)
}
 0x24d   : > { %s1053_s29 = smov 128   ;;  %s1054_s14 = smov 8  }
 0x24e   : > { %778 = dma.vmem_to_hbm [thread:$0]  (%p1371_p12), %s1298_s22, 512, %s1303_s5, %s551_s18, %s1053_s29, %s1053_s29, %s1054_s14  }
 0x24f PF: > { %s579_s28 = sand.u32 1, %s1025_s15   ;;  %p1372_p3 = scmp.ne.s32.totalorder %s1364_s26, 0 }
 0x250   : > { %p1373_p5 = scmp.ge.s32.totalorder %s1045_s20, 2  ;;  %s580_s6 = scalar_lea.sflag [#allocation5], %s579_s28 }
 0x252   : > { %p792_p9 = pnand %p1373_p5, %p1372_p3 }
 0x254   : > { %1020 = dma.done.wait (!%p792_p9), %s580_s6, 512  }
 0x255   : > { %1022 = vsyncadd (!%p792_p9), %s580_s6, 4294966784  ;;  %s21_s20 = sadd.s32 1, %s1045_s20   ;;  %s1374_s15 = smov %s1029_s16 }
 0x256   : > { %p18_p11 = scmp.ge.s32.totalorder %s21_s20, 4   ;;  %s1375_s16 = smov %s1033_s17 }
 0x257   : > { %s1376_s17 = smov %s1228_s11  ;;  %s1377_s18 = smov %s1041_s19 }
 0x258   : > { %s1378_s19 = smov %s1380_s30  ;;  %20 = sbr.rel (!%p18_p11) target bundleno = 7 (0x7), region = 98 }
 0x25f   :  { %585 = vsyncpa [#allocation4], 1 }
 0x260   :  { %587 = vsyncpa [#allocation4 + $0x1], 1 }
 0x261   :  { %588 = vsyncpa [#allocation7], 1 }
 0x262   :  { %589 = vsyncpa [#allocation5], 1 }
 0x263   :  { %591 = vsyncpa [#allocation5 + $0x1], 1 }

</bundles_post_ra>
